<compile_context>
chip_gen: v7x
topology: tpu7x:2x2x1
jax: 0.10.0
libtpu: 0.0.40
codegen_flags: <defaults>
</compile_context>

<pallas_src>
import math

import jax
import jax.numpy as jnp
from jax.experimental import pallas as pl
from jax.experimental.pallas import tpu as pltpu


def _round_up(a, b):
    return ((a + b - 1) // b) * b


def _pick_tile(dim, pref, q):
    """Largest tile <= pref that is a multiple of q and divides the (possibly padded) dim."""
    pref = max(q, (pref // q) * q)
    if dim <= pref:
        return _round_up(dim, q)
    t = pref
    while t > q and dim % t != 0:
        t -= q
    return t if dim % t == 0 else q


# ----------------------------------------------------------------------------- #
# Tiled matmul with fused epilogue (bias / activation / residual / layer norm)
# ----------------------------------------------------------------------------- #
def pallas_matmul_fused(x, w, b=None, *, residual=None, activation=None,
                        ln_params=None, emit_main=True, rhs_transposed=False,
                        out_dtype=jnp.float32, ln_dtype=jnp.bfloat16, ln_eps=1e-5,
                        tm=512, tn=512, tk=512):
    """out = act(x @ w (+ b)) (+ residual); optionally also LN(out) as a 2nd output.

    x: [M, K] (bf16 preferred), w: [K, N] or [N, K] if rhs_transposed.
    b: [N] or None.  residual: [M, N] f32 or None.
    ln_params: (gamma[N], beta[N]) -> emits LayerNorm(out) in ln_dtype; needs tn == N.
    Accumulation is f32 on the MXU.  M/N/K are zero-padded to tile multiples.
    """
    M, K = x.shape
    if rhs_transposed:
        N, K2 = w.shape
    else:
        K2, N = w.shape
    assert K2 == K
    has_bias = b is not None
    has_res = residual is not None
    has_ln = ln_params is not None
    assert emit_main or has_ln

    qm = 16 if x.dtype == jnp.bfloat16 else 8          # sublane quantum for the lhs
    tm_e = _pick_tile(M, tm, qm)
    if has_ln:
        tn_e = N                                        # epilogue LN needs full rows
        cap = max(qm, (((4 << 20) // max(1, N * 4)) // qm) * qm)
        tm_e = max(qm, min(tm_e, cap))                  # keep output slab modest if N is huge
    else:
        tn_e = _pick_tile(N, tn, 128)
    tk_e = _pick_tile(K, tk, 128)

    Mp, Np, Kp = _round_up(M, tm_e), _round_up(N, tn_e), _round_up(K, tk_e)

    def pad2(a, r, c):
        return a if a.shape == (r, c) else jnp.pad(a, ((0, r - a.shape[0]), (0, c - a.shape[1])))

    x_p = pad2(x, Mp, Kp)
    w_p = pad2(w, Np, Kp) if rhs_transposed else pad2(w, Kp, Np)

    grid = (Mp // tm_e, Np // tn_e, Kp // tk_e)
    nk = grid[2]

    def kernel(*refs):
        it = iter(refs)
        x_ref = next(it)
        w_ref = next(it)
        b_ref = next(it) if has_bias else None
        r_ref = next(it) if has_res else None
        g_ref = next(it) if has_ln else None
        be_ref = next(it) if has_ln else None
        o_ref = next(it) if emit_main else None
        oln_ref = next(it) if has_ln else None
        acc_ref = next(it)

        k = pl.program_id(2)

        @pl.when(k == 0)
        def _():
            acc_ref[...] = jnp.zeros_like(acc_ref)

        if rhs_transposed:
            # Contract on the shared last (K) dim of both operands (A @ B^T on the MXU).
            acc_ref[...] += jax.lax.dot_general(
                x_ref[...], w_ref[...], (((1,), (1,)), ((), ())),
                preferred_element_type=jnp.float32)
        else:
            acc_ref[...] += jnp.dot(x_ref[...], w_ref[...],
                                    preferred_element_type=jnp.float32)

        @pl.when(k == nk - 1)
        def _():
            out = acc_ref[...]
            if has_bias:
                out = out + b_ref[...]
            if activation is not None:
                out = activation(out)
            if has_res:
                out = out + r_ref[...]
            if emit_main:
                o_ref[...] = out.astype(o_ref.dtype)
            if has_ln:
                # Full rows are present (tn == N) -> exact LayerNorm in the epilogue.
                mu = jnp.mean(out, axis=-1, keepdims=True)
                var = jnp.mean((out - mu) ** 2, axis=-1, keepdims=True)
                y = (out - mu) * jax.lax.rsqrt(var + ln_eps) * g_ref[...] + be_ref[...]
                oln_ref[...] = y.astype(oln_ref.dtype)

    in_specs = [pl.BlockSpec((tm_e, tk_e), lambda i, j, k: (i, k))]
    inputs = [x_p]
    if rhs_transposed:
        in_specs.append(pl.BlockSpec((tn_e, tk_e), lambda i, j, k: (j, k)))
    else:
        in_specs.append(pl.BlockSpec((tk_e, tn_e), lambda i, j, k: (k, j)))
    inputs.append(w_p)
    if has_bias:
        b_p = jnp.pad(b.astype(jnp.float32), (0, Np - N)).reshape(1, Np)
        in_specs.append(pl.BlockSpec((1, tn_e), lambda i, j, k: (0, j)))
        inputs.append(b_p)
    if has_res:
        in_specs.append(pl.BlockSpec((tm_e, tn_e), lambda i, j, k: (i, j)))
        inputs.append(pad2(residual, Mp, Np))
    if has_ln:
        gamma, beta = ln_params
        in_specs.append(pl.BlockSpec((1, tn_e), lambda i, j, k: (0, j)))
        inputs.append(gamma.astype(jnp.float32).reshape(1, N))
        in_specs.append(pl.BlockSpec((1, tn_e), lambda i, j, k: (0, j)))
        inputs.append(beta.astype(jnp.float32).reshape(1, N))

    out_shapes, out_specs = [], []
    if emit_main:
        out_shapes.append(jax.ShapeDtypeStruct((Mp, Np), out_dtype))
        out_specs.append(pl.BlockSpec((tm_e, tn_e), lambda i, j, k: (i, j)))
    if has_ln:
        out_shapes.append(jax.ShapeDtypeStruct((Mp, Np), ln_dtype))
        out_specs.append(pl.BlockSpec((tm_e, tn_e), lambda i, j, k: (i, j)))

    multi = len(out_shapes) > 1
    results = pl.pallas_call(
        kernel,
        out_shape=tuple(out_shapes) if multi else out_shapes[0],
        grid=grid,
        in_specs=in_specs,
        out_specs=tuple(out_specs) if multi else out_specs[0],
        scratch_shapes=[pltpu.VMEM((tm_e, tn_e), jnp.float32)],
        compiler_params=pltpu.CompilerParams(
            dimension_semantics=("parallel", "parallel", "arbitrary")),
    )(*inputs)

    def unpad(a):
        return a if (Mp == M and Np == N) else a[:M, :N]

    if multi:
        main, lnout = results
        return unpad(main), unpad(lnout)
    res = results[0] if isinstance(results, (tuple, list)) else results
    return unpad(res)


# ----------------------------------------------------------------------------- #
# Prefix attention: flash-style online softmax, mask built from prefetched `sep`
# ----------------------------------------------------------------------------- #
def pallas_attention(qkv, sep, H):
    """Single-head prefix attention over a fused qkv buffer.

    qkv: [B, S, 3H] bf16 (q | k | v along the last axis).  sep: [B] int32.
    Key j is visible to query i iff j < sep[b] or j <= i.
    Returns [B, S, H] bf16.
    """
    B, S, threeH = qkv.shape
    assert threeH == 3 * H
    scale = 1.0 / math.sqrt(H)

    Bb = 1
    for cand in (8, 4, 2, 1):                 # block a few batch rows per grid step
        if B % cand == 0:
            Bb = cand
            break
    tq = S if S <= 128 else 128
    tk = S if S <= 128 else 128
    assert S % tq == 0 and S % tk == 0        # TODO(synk): pad/mask ragged sequence lengths
    grid = (B // Bb, S // tq, S // tk)

    def kernel(sep_ref, q_ref, k_ref, v_ref, o_ref, m_sc, l_sc, acc_sc):
        bi, qi, ki = pl.program_id(0), pl.program_id(1), pl.program_id(2)

        @pl.when(ki == 0)
        def _():
            # finite "-inf" so exp(m_prev - m_new) underflows to 0 without NaNs
            m_sc[...] = jnp.full_like(m_sc, -1e30)
            l_sc[...] = jnp.zeros_like(l_sc)
            acc_sc[...] = jnp.zeros_like(acc_sc)

        q = q_ref[...]                                        # [Bb, tq, H] bf16
        k = k_ref[...]                                        # [Bb, tk, H] bf16
        v = v_ref[...]                                        # [Bb, tk, H] bf16
        s = jnp.einsum("bqd,bkd->bqk", q, k,
                       preferred_element_type=jnp.float32) * scale   # [Bb, tq, tk] f32

        # Prefix-LM mask: one (tq,1)/(1,tk) iota pair, single compare per row.
        b0 = bi * Bb
        i_idx = qi * tq + jax.lax.broadcasted_iota(jnp.int32, (tq, 1), 0)
        j_idx = ki * tk + jax.lax.broadcasted_iota(jnp.int32, (1, tk), 1)
        neg = jnp.float32(-1e9)                               # f32 only (bf16 would saturate)
        masked = []
        for bb in range(Bb):                                  # Bb is small & static
            sp = sep_ref[b0 + bb]
            allowed = j_idx <= jnp.maximum(i_idx, sp - 1)     # j < sep  OR  j <= i
            masked.append(jnp.where(allowed, s[bb], neg))
        s = jnp.stack(masked, axis=0)                         # [Bb, tq, tk]

        m_prev = m_sc[...]
        m_new = jnp.maximum(m_prev, jnp.max(s, axis=-1, keepdims=True))
        alpha = jnp.exp(m_prev - m_new)
        p = jnp.exp(s - m_new)
        l_sc[...] = alpha * l_sc[...] + jnp.sum(p, axis=-1, keepdims=True)
        acc_sc[...] = alpha * acc_sc[...] + jnp.einsum(
            "bqk,bkd->bqd", p.astype(v.dtype), v, preferred_element_type=jnp.float32)
        m_sc[...] = m_new

        @pl.when(ki == pl.num_programs(2) - 1)
        def _():
            # approx reciprocal = EUP op (~1e-3 rel. error), fine for bf16 outputs.
            o_ref[...] = (acc_sc[...] * pl.reciprocal(l_sc[...], approx=True)
                          ).astype(o_ref.dtype)

    if H % 128 == 0:
        # Index straight into the fused qkv buffer (block offsets 0 / H / 2H along
        # the last axis) -> no XLA split copy of q/k/v.
        q_in = k_in = v_in = qkv
        q_spec = pl.BlockSpec((Bb, tq, H), lambda bi, qi, ki, sep: (bi, qi, 0))
        k_spec = pl.BlockSpec((Bb, tk, H), lambda bi, qi, ki, sep: (bi, ki, 1))
        v_spec = pl.BlockSpec((Bb, tk, H), lambda bi, qi, ki, sep: (bi, ki, 2))
    else:
        # TODO(synk): lane-unaligned H falls back to an XLA split (one extra copy).
        q_in, k_in, v_in = jnp.split(qkv, 3, axis=-1)
        q_spec = pl.BlockSpec((Bb, tq, H), lambda bi, qi, ki, sep: (bi, qi, 0))
        k_spec = pl.BlockSpec((Bb, tk, H), lambda bi, qi, ki, sep: (bi, ki, 0))
        v_spec = pl.BlockSpec((Bb, tk, H), lambda bi, qi, ki, sep: (bi, ki, 0))

    grid_spec = pltpu.PrefetchScalarGridSpec(
        num_scalar_prefetch=1,
        grid=grid,
        in_specs=[q_spec, k_spec, v_spec],
        out_specs=pl.BlockSpec((Bb, tq, H), lambda bi, qi, ki, sep: (bi, qi, 0)),
        scratch_shapes=[pltpu.VMEM((Bb, tq, 1), jnp.float32),     # running max
                        pltpu.VMEM((Bb, tq, 1), jnp.float32),     # running denom
                        pltpu.VMEM((Bb, tq, H), jnp.float32)],    # running accumulator
    )
    return pl.pallas_call(
        kernel,
        out_shape=jax.ShapeDtypeStruct((B, S, H), qkv.dtype),
        grid_spec=grid_spec,
        compiler_params=pltpu.CompilerParams(
            dimension_semantics=("parallel", "parallel", "arbitrary")),
    )(sep.astype(jnp.int32), q_in, k_in, v_in)


# ----------------------------------------------------------------------------- #
# Gather the [MASK]-position hidden state (one row per batch element)
# ----------------------------------------------------------------------------- #
def pallas_gather_rows(x2d, flat_pos, B):
    """x2d: [M, H], flat_pos: [B] int32 (row indices, already clamped) -> [B, H]."""
    M, H = x2d.shape

    def kernel(pos_ref, x_ref, o_ref):
        o_ref[0] = x_ref[...]                # x_ref is the single gathered (1, H) row

    grid_spec = pltpu.PrefetchScalarGridSpec(
        num_scalar_prefetch=1,
        grid=(B,),
        in_specs=[pl.BlockSpec((pl.Element(1), H), lambda b, pos: (pos[b], 0))],
        out_specs=pl.BlockSpec((1, 1, H), lambda b, pos: (b, 0, 0)),
    )
    out = pl.pallas_call(
        kernel,
        out_shape=jax.ShapeDtypeStruct((B, 1, H), x2d.dtype),
        grid_spec=grid_spec,
        compiler_params=pltpu.CompilerParams(dimension_semantics=("parallel",)),
    )(flat_pos.astype(jnp.int32), x2d)
    return out.reshape(B, H)


def gather_mask_rows(x2d, sep, B, S):
    """Gather x2d[b*S + clamp(sep[b])] -> [B, H]."""
    pos = jnp.clip(sep, 0, S - 1).astype(jnp.int32) + jnp.arange(B, dtype=jnp.int32) * S
    try:
        return pallas_gather_rows(x2d, pos, B)
    except Exception:
        # TODO(synk): fallback to a tiny XLA gather if Element-indexed BlockSpecs
        # are unavailable on this JAX version.
        return x2d[pos]


# ----------------------------------------------------------------------------- #
# Cloze readout over [B, V] target logits (log_softmax + target_ids gather)
# ----------------------------------------------------------------------------- #
def pallas_cloze(target_logits, target_ids, take_softmax):
    """target_logits: [B, V] f32, target_ids: [B, T] int32 -> output [B, T] f32."""
    B, V = target_logits.shape
    T = target_ids.shape[1]
    T_pad = max(128, _round_up(T, 128))      # lane-dense output slab
    tid_pad = jnp.zeros((B, T_pad), jnp.int32).at[:, :T].set(target_ids)

    def kernel(tl_ref, tid_ref, o_ref):
        row = tl_ref[...]                                          # [B, V] f32
        if take_softmax:
            m = jnp.max(row, axis=-1, keepdims=True)
            z = row - m
            prob = z - jnp.log(jnp.sum(jnp.exp(z), axis=-1, keepdims=True))
        else:
            prob = row
        iota_v = jax.lax.broadcasted_iota(jnp.int32, (B, V), 1)
        iota_t = jax.lax.broadcasted_iota(jnp.int32, (B, T_pad), 1)
        out = jnp.zeros((B, T_pad), jnp.float32)
        # TODO(synk): if T grows, replace with a one-hot matmul (single MXU pass).
        for t in range(T):                    # T = number of cloze choices, tiny & static
            tid_col = tid_ref[:, pl.ds(t, 1)]                      # [B, 1]
            val = jnp.sum(jnp.where(iota_v == tid_col, prob, 0.0),
                          axis=-1, keepdims=True)                  # [B, 1]
            out = jnp.where(iota_t == t, val, out)
        o_ref[...] = out

    out = pl.pallas_call(
        kernel,
        out_shape=jax.ShapeDtypeStruct((B, T_pad), jnp.float32),
        grid=(1,),
        in_specs=[pl.BlockSpec((B, V), lambda i: (0, 0)),
                  pl.BlockSpec((B, T_pad), lambda i: (0, 0))],
        out_specs=pl.BlockSpec((B, T_pad), lambda i: (0, 0)),
    )(target_logits, tid_pad)
    return out[:, :T]


# ----------------------------------------------------------------------------- #
# Synthetic GLM language model + GLMForSingleTokenCloze.forward (glue in JAX)
# ----------------------------------------------------------------------------- #
def layer_norm(x, g, b, eps=1e-5):
    mu = jnp.mean(x, axis=-1, keepdims=True)
    var = jnp.mean((x - mu) ** 2, axis=-1, keepdims=True)
    return (x - mu) * jax.lax.rsqrt(var + eps) * g + b


def _gelu(x):
    return jax.nn.gelu(x, approximate=True)


def glm_encoder(params, input_ids, position_ids, sep):
    """Runs the synthetic 1-layer GLM; returns final-LN hidden states [B*S, H] bf16."""
    B, S = input_ids.shape
    V, H = params["word_emb"].shape
    bf16 = jnp.bfloat16
    M = B * S

    # Embedding lookups (glue), residual stream kept in f32.
    h0 = params["word_emb"][input_ids] + params["pos_emb"][position_ids]      # [B,S,H] f32
    h0_2d = h0.reshape(M, H)
    x1 = layer_norm(h0_2d, params["ln1_g"], params["ln1_b"]).astype(bf16)     # ln1 stays as glue

    # --- attention block -------------------------------------------------------
    qkv = pallas_matmul_fused(x1, params["w_qkv"].astype(bf16), params["b_qkv"],
                              out_dtype=bf16)                                  # [M, 3H] bf16
    ctx = pallas_attention(qkv.reshape(B, S, 3 * H), sep, H)                   # [B,S,H] bf16
    # w_o matmul: fused bias + residual + LayerNorm(ln2) epilogue -> h1 (f32) and x2 (bf16)
    h1, x2 = pallas_matmul_fused(ctx.reshape(M, H), params["w_o"].astype(bf16),
                                 params["b_o"], residual=h0_2d,
                                 ln_params=(params["ln2_g"], params["ln2_b"]),
                                 out_dtype=jnp.float32, ln_dtype=bf16)

    # --- MLP block --------------------------------------------------------------
    ffn1 = pallas_matmul_fused(x2, params["w_ff1"].astype(bf16), params["b_ff1"],
                               activation=_gelu, out_dtype=bf16)               # fused bias+GELU
    # w_ff2 matmul: fused bias + residual + LayerNorm(lnf); only the LN'd bf16 stream is needed.
    x3 = pallas_matmul_fused(ffn1, params["w_ff2"].astype(bf16), params["b_ff2"],
                             residual=h1, ln_params=(params["lnf_g"], params["lnf_b"]),
                             emit_main=False, ln_dtype=bf16)                   # [M, H] bf16
    return x3


def glm_single_token_cloze_forward(params, input_ids, position_ids, attention_mask,
                                   target_ids=None, logit_mask=None, prompt_pos=None,
                                   take_softmax=True):
    # PyTorch does `attention_mask -= 3` in place; functional here.
    # TODO(synk): prompt_pos / logit_mask are unused by this synthetic single-layer LM.
    sep = (attention_mask - 3).astype(jnp.int32)
    B, S = input_ids.shape
    V, H = params["word_emb"].shape
    x3 = glm_encoder(params, input_ids, position_ids, sep)                    # [B*S, H] bf16
    we_bf = params["word_emb"].astype(jnp.bfloat16)                            # [V, H], no .T

    if target_ids is None:
        # Full logits are only needed when no cloze targets are given.
        logits = pallas_matmul_fused(x3, we_bf, rhs_transposed=True,
                                     out_dtype=jnp.float32, tn=512, tk=max(128, H))
        return logits.reshape(B, S, V)

    assert input_ids.ndim == 2
    # Gather only the [MASK]-position rows (clamped: VMEM OOB has no runtime check).
    x_masked = gather_mask_rows(x3, sep, B, S)                                 # [B, H] bf16
    # Tied LM head on [B,H] x [V,H]^T: memory-bound on the weights -> large tn, tk = H.
    target_logits = pallas_matmul_fused(x_masked, we_bf, rhs_transposed=True,
                                        out_dtype=jnp.float32,
                                        tm=16, tn=512, tk=max(128, H))         # [B, V] f32
    output = pallas_cloze(target_logits, target_ids.astype(jnp.int32), take_softmax)
    # No mems for this synthetic single-layer LM (GLM returns (output, target_logits, *mems)).
    return output, target_logits


# ----------------------------------------------------------------------------- #
# Pure-JAX reference (mirrors the bf16 quantization points of the kernel path)
# ----------------------------------------------------------------------------- #
def reference_forward(params, input_ids, position_ids, attention_mask, target_ids,
                      take_softmax=True):
    hp = jax.lax.Precision.HIGHEST
    f32, bf16 = jnp.float32, jnp.bfloat16
    sep = (attention_mask - 3).astype(jnp.int32)
    B, S = input_ids.shape
    V, H = params["word_emb"].shape

    def bmm(x, w):   # bf16 inputs, f32 accumulation (mirrors the MXU path)
        return jnp.dot(x.astype(bf16).astype(f32), w.astype(bf16).astype(f32), precision=hp)

    h0 = params["word_emb"][input_ids] + params["pos_emb"][position_ids]
    x1 = layer_norm(h0, params["ln1_g"], params["ln1_b"])
    qkv = (bmm(x1, params["w_qkv"]) + params["b_qkv"]).astype(bf16)
    q, k, v = jnp.split(qkv, 3, axis=-1)
    scale = 1.0 / math.sqrt(H)
    scores = jnp.einsum("bqh,bkh->bqk", q.astype(f32), k.astype(f32), precision=hp) * scale
    i_idx = jnp.arange(S)[None, :, None]
    j_idx = jnp.arange(S)[None, None, :]
    allowed = (j_idx < sep[:, None, None]) | (j_idx <= i_idx)
    scores = jnp.where(allowed, scores, -1e9)
    p = jax.nn.softmax(scores, axis=-1).astype(bf16)
    ctx = jnp.einsum("bqk,bkh->bqh", p.astype(f32), v.astype(f32), precision=hp).astype(bf16)
    h1 = h0 + bmm(ctx, params["w_o"]) + params["b_o"]
    x2 = layer_norm(h1, params["ln2_g"], params["ln2_b"])
    ffn1 = _gelu(bmm(x2, params["w_ff1"]) + params["b_ff1"]).astype(bf16)
    h2 = h1 + bmm(ffn1, params["w_ff2"]) + params["b_ff2"]
    x3 = layer_norm(h2, params["lnf_g"], params["lnf_b"])

    batch_ids = jnp.arange(B)
    x3m = x3[batch_ids, sep]                                                   # [B, H]
    target_logits = bmm(x3m, params["word_emb"].T)                             # [B, V]
    target_prob = jax.nn.log_softmax(target_logits, axis=-1) if take_softmax else target_logits
    output = target_prob[batch_ids[:, None], target_ids]
    return output, target_logits


# ----------------------------------------------------------------------------- #
# Main
# ----------------------------------------------------------------------------- #
if __name__ == "__main__":
    B, S, H, V, T = 2, 8, 128, 512, 2    # batch, seq, hidden, vocab, num cloze choices
    F = 4 * H

    key = jax.random.PRNGKey(0)
    ks = jax.random.split(key, 10)
    scale = 0.02
    params = {
        "word_emb": jax.random.normal(ks[0], (V, H), jnp.float32) * scale,
        "pos_emb": jax.random.normal(ks[1], (S, H), jnp.float32) * scale,
        "ln1_g": jnp.ones((H,), jnp.float32), "ln1_b": jnp.zeros((H,), jnp.float32),
        "w_qkv": jax.random.normal(ks[2], (H, 3 * H), jnp.float32) * scale,
        "b_qkv": jnp.zeros((3 * H,), jnp.float32),
        "w_o": jax.random.normal(ks[3], (H, H), jnp.float32) * scale,
        "b_o": jnp.zeros((H,), jnp.float32),
        "ln2_g": jnp.ones((H,), jnp.float32), "ln2_b": jnp.zeros((H,), jnp.float32),
        "w_ff1": jax.random.normal(ks[4], (H, F), jnp.float32) * scale,
        "b_ff1": jnp.zeros((F,), jnp.float32),
        "w_ff2": jax.random.normal(ks[5], (F, H), jnp.float32) * scale,
        "b_ff2": jnp.zeros((H,), jnp.float32),
        "lnf_g": jnp.ones((H,), jnp.float32), "lnf_b": jnp.zeros((H,), jnp.float32),
    }

    input_ids = jax.random.randint(ks[6], (B, S), 0, V, dtype=jnp.int32)
    position_ids = jnp.broadcast_to(jnp.arange(S, dtype=jnp.int32), (B, S))
    # attention_mask = mask-token position + 3 (forward subtracts 3 before use)
    attention_mask = jnp.array([4, 6], dtype=jnp.int32) + 3
    target_ids = jax.random.randint(ks[7], (B, T), 0, V, dtype=jnp.int32)

    output, target_logits = glm_single_token_cloze_forward(
        params, input_ids, position_ids, attention_mask, target_ids, take_softmax=True
    )
    output = jax.block_until_ready(output)
    target_logits = jax.block_until_ready(target_logits)

    ref_out, ref_tl = reference_forward(
        params, input_ids, position_ids, attention_mask, target_ids, take_softmax=True
    )

    assert output.shape == (B, T) and target_logits.shape == (B, V)
    assert bool(jnp.all(jnp.isfinite(output))) and bool(jnp.all(jnp.isfinite(target_logits)))
    # Tolerances cover the deliberate bf16 / online-softmax / approx-reciprocal trade-offs.
    assert bool(jnp.allclose(target_logits, ref_tl, rtol=2e-2, atol=1e-2)), "target_logits mismatch"
    assert bool(jnp.allclose(output, ref_out, rtol=2e-2, atol=1e-2)), "output mismatch"

    print("KERNEL_OK")
</pallas_src>

<mosaic_0001>
module attributes {stable_mosaic.version = 11 : i64} {
  func.func @kernel(%arg0: i32, %arg1: i32, %arg2: i32, %arg3: memref<16x128xbf16, #tpu.memory_space<vmem>>, %arg4: memref<128x384xbf16, #tpu.memory_space<vmem>>, %arg5: memref<1x384xf32, #tpu.memory_space<vmem>>, %arg6: memref<16x384xbf16, #tpu.memory_space<vmem>>, %arg7: memref<16x384xf32, #tpu.memory_space<vmem>>) attributes {dimension_semantics = [#tpu.dimension_semantics<parallel>, #tpu.dimension_semantics<parallel>, #tpu.dimension_semantics<arbitrary>], iteration_bounds = array<i64: 1, 1, 1>, scalar_prefetch = 0 : i64, scratch_operands = 1 : i64, tpu.core_type = #tpu.core_type<tc>, window_params = [{transform_indices = @transform_0, window_bounds = array<i64: 16, 128>}, {transform_indices = @transform_1, window_bounds = array<i64: 128, 384>}, {transform_indices = @transform_2, window_bounds = array<i64: 1, 384>}, {transform_indices = @transform_3, window_bounds = array<i64: 16, 384>}]} {
    %c0_i32 = arith.constant 0 : i32
    %0 = arith.cmpi eq, %arg2, %c0_i32 : i32
    %1 = arith.extui %0 : i1 to i32
    %c0_i32_0 = arith.constant 0 : i32
    %2 = arith.cmpi ne, %1, %c0_i32_0 : i32
    scf.if %2 {
      %cst_10 = arith.constant 0.000000e+00 : f32
      %12 = vector.broadcast %cst_10 : f32 to vector<16x384xf32>
      %c0_11 = arith.constant 0 : index
      %c0_12 = arith.constant 0 : index
      %13 = vector.load %arg7[%c0_11, %c0_12] : memref<16x384xf32, #tpu.memory_space<vmem>>, vector<16x384xf32>
      tpu.vector_store %arg7[%c0_11, %c0_12], %12 {strides = array<i32>} : memref<16x384xf32, #tpu.memory_space<vmem>>, vector<16x384xf32>,
    } else {
    }
    %c0 = arith.constant 0 : index
    %c0_1 = arith.constant 0 : index
    %3 = vector.load %arg7[%c0, %c0_1] : memref<16x384xf32, #tpu.memory_space<vmem>>, vector<16x384xf32>
    %c0_2 = arith.constant 0 : index
    %c0_3 = arith.constant 0 : index
    %4 = vector.load %arg3[%c0_2, %c0_3] : memref<16x128xbf16, #tpu.memory_space<vmem>>, vector<16x128xbf16>
    %c0_4 = arith.constant 0 : index
    %c0_5 = arith.constant 0 : index
    %5 = vector.load %arg4[%c0_4, %c0_5] : memref<128x384xbf16, #tpu.memory_space<vmem>>, vector<128x384xbf16>
    %cst = arith.constant dense<0.000000e+00> : vector<16x384xf32>
    %6 = tpu.matmul %4, %5, %cst {dimension_numbers = #tpu.dot_dimension_numbers<[1], [0], [0], [1], [0, 0, 1, 1], [], []>} : vector<16x128xbf16>, vector<128x384xbf16>, vector<16x384xf32> -> vector<16x384xf32>
    %7 = arith.addf %3, %6 : vector<16x384xf32>
    %c0_6 = arith.constant 0 : index
    %c0_7 = arith.constant 0 : index
    %8 = vector.load %arg7[%c0_6, %c0_7] : memref<16x384xf32, #tpu.memory_space<vmem>>, vector<16x384xf32>
    tpu.vector_store %arg7[%c0_6, %c0_7], %7 {strides = array<i32>} : memref<16x384xf32, #tpu.memory_space<vmem>>, vector<16x384xf32>,
    %c0_i32_8 = arith.constant 0 : i32
    %9 = arith.cmpi eq, %arg2, %c0_i32_8 : i32
    %10 = arith.extui %9 : i1 to i32
    %c0_i32_9 = arith.constant 0 : i32
    %11 = arith.cmpi ne, %10, %c0_i32_9 : i32
    scf.if %11 {
      %c0_10 = arith.constant 0 : index
      %c0_11 = arith.constant 0 : index
      %12 = vector.load %arg7[%c0_10, %c0_11] : memref<16x384xf32, #tpu.memory_space<vmem>>, vector<16x384xf32>
      %c0_12 = arith.constant 0 : index
      %c0_13 = arith.constant 0 : index
      %13 = vector.load %arg5[%c0_12, %c0_13] : memref<1x384xf32, #tpu.memory_space<vmem>>, vector<1x384xf32>
      %14 = vector.broadcast %13 : vector<1x384xf32> to vector<16x384xf32>
      %15 = arith.addf %12, %14 : vector<16x384xf32>
      %16 = arith.truncf %15 : vector<16x384xf32> to vector<16x384xbf16>
      %c0_14 = arith.constant 0 : index
      %c0_15 = arith.constant 0 : index
      %17 = vector.load %arg6[%c0_14, %c0_15] : memref<16x384xbf16, #tpu.memory_space<vmem>>, vector<16x384xbf16>
      tpu.vector_store %arg6[%c0_14, %c0_15], %16 {strides = array<i32>} : memref<16x384xbf16, #tpu.memory_space<vmem>>, vector<16x384xbf16>,
    } else {
    }
    return
  }
  func.func @transform_0(%arg0: i32, %arg1: i32, %arg2: i32) -> (i32, i32) {
    %c0_i32 = arith.constant 0 : i32
    return %arg0, %arg2 : i32, i32
  }
  func.func @transform_1(%arg0: i32, %arg1: i32, %arg2: i32) -> (i32, i32) {
    %c0_i32 = arith.constant 0 : i32
    return %arg2, %arg1 : i32, i32
  }
  func.func @transform_2(%arg0: i32, %arg1: i32, %arg2: i32) -> (i32, i32) {
    %c0_i32 = arith.constant 0 : i32
    %c0_i32_0 = arith.constant 0 : i32
    return %c0_i32, %arg1 : i32, i32
  }
  func.func @transform_3(%arg0: i32, %arg1: i32, %arg2: i32) -> (i32, i32) {
    %c0_i32 = arith.constant 0 : i32
    return %arg0, %arg1 : i32, i32
  }
}

</mosaic_0001>

<bundles_post_ra>
// kernel: tpu_custom_call.1
= control target key start
LH: loop header
LB: loop body
LE: loop exit
PB: predicated region body
PF: predicated region fallthrough
CT: control target
= control target key end

     0   :  { %8 = vsyncpa [#allocation4], 0  ;;  %s650_s0 = inlined_call_operand.hbm [shape: bf16[16,128], index: 0, kind: input, shape index: {}]   ;;  %s651_s1 = inlined_call_operand.hbm [shape: bf16[128,384], index: 1, kind: input, shape index: {}]   ;;  %s652_s2 = inlined_call_operand.vmem [shape: f32[1,384], index: 2, kind: input, shape index: {}]   ;;  %s653_s3 = inlined_call_operand.hbm [shape: bf16[16,384], index: 3, kind: output, shape index: {}]  }
   0x1   :  { %9 = vsyncpa [#allocation7], 0 }
   0x2   :  { %10 = vsyncpa [#allocation5], 0  ;;  %s575_s12 = smov [#allocation3]   ;;  %s503_s16 = scalar_lea.hbm %s650_s0, 128 }
   0x3   :  { %s16_s13 = sshll.u32 %s575_s12, 4  ;;  %p504_p0 = scmp.ne.s32.totalorder %s650_s0, %s503_s16  ;;  %s17_s13 = int_to_ptr.vmem [resolvable:$true] %s16_s13 }
   0x4   :  { %p507_p1 = scmp.lt.u32.totalorder %s503_s16, %s650_s0 }
   0x6   :  { %p509_p2 = pnand %p507_p1, %p504_p0 }
   0x8   :  { %512 = shalt.err (!%p509_p2)
}
   0x9   :  { %s513_s21 = scalar_lea.vmem %s17_s13, 128  ;;  %p518_p4 = scmp.lt.s32.totalorder %s17_s13, %s17_s13 }
   0xa   :  { %p514_p3 = scmp.ne.s32.totalorder %s17_s13, %s513_s21  ;;  %p519_p5 = scmp.lt.s32.totalorder %s513_s21, %s513_s21 }
   0xc   :  { %p520_p6 = por %p519_p5, %p518_p4 }
   0xe   :  { %p521_p7 = pnand %p520_p6, %p514_p3 }
  0x10   :  { %524 = shalt.err (!%p521_p7)
}
  0x11   :  { %s576_s22 = smov 64   ;;  %s577_s23 = smov 4  }
  0x12   :  { %22 = dma.hbm_to_vmem [thread:$0]  %s650_s0, 128, %s17_s13, [#allocation4], %s576_s22, %s576_s22, %s577_s23  }
  0x13   :  { %s578_s26 = smov [#allocation6]   ;;  %s525_s30 = scalar_lea.hbm %s651_s1, 3072 }
  0x14   :  { %s28_s27 = sshll.u32 %s578_s26, 4  ;;  %p526_p8 = scmp.ne.s32.totalorder %s651_s1, %s525_s30  ;;  %s29_s27 = int_to_ptr.vmem [resolvable:$true] %s28_s27 }
  0x15   :  { %p529_p9 = scmp.lt.u32.totalorder %s525_s30, %s651_s1 }
  0x17   :  { %p531_p10 = pnand %p529_p9, %p526_p8 }
  0x19   :  { %534 = shalt.err (!%p531_p10)
}
  0x1a   :  { %s535_s8 = scalar_lea.vmem %s29_s27, 3072  ;;  %p540_p12 = scmp.lt.s32.totalorder %s29_s27, %s29_s27 }
  0x1b   :  { %p536_p11 = scmp.ne.s32.totalorder %s29_s27, %s535_s8  ;;  %p541_p13 = scmp.lt.s32.totalorder %s535_s8, %s535_s8 }
  0x1d   :  { %p542_p0 = por %p541_p13, %p540_p12 }
  0x1f   :  { %p543_p1 = pnand %p542_p0, %p536_p11 }
  0x21   :  { %546 = shalt.err (!%p543_p1)
}
  0x22   :  { %s579_s0 = smov 192   ;;  %s580_s9 = smov 12  }
  0x23   :  { %34 = dma.hbm_to_vmem [thread:$0]  %s651_s1, 3072, %s29_s27, [#allocation7], %s579_s0, %s579_s0, %s580_s9  }
  0x24   :  { %569 = dma.done.wait [#allocation4], 128  }
  0x25   :  { %570 = vsyncadd [#allocation4], 4294967168 }
  0x26   :  { %571 = dma.done.wait [#allocation7], 3072  }
  0x27   :  { %572 = vsyncadd [#allocation7], 4294964224  ;;  %v581_v0 = vmov 0.0   ;;  %vm582_vm0 = vmmov 0   ;;  %v583_v1 = vmov 0   ;;  %v502_v26 = vld [vmem:[#allocation3] sm:$0xff]   ;;  %v335_v27 = vlaneseq }
  0x28   :  { %440 = vmatprep.subr.bf16.mxu1 %v581_v0  ;;  %456 = vmatprep.mubr.msk.bf16.mxu1 %vm582_vm0, %v581_v0  ;;  %v470_v2 = vld [vmem:[#allocation6 + $0x4] ss:$12 sps:$4 sm:$0xff]   ;;  %v472_v3 = vld [vmem:[#allocation6 + $0x8] ss:$12 sps:$4 sm:$0xff]   ;;  %v473_v4 = vld [vmem:[#allocation6] ss:$12 sps:$4 sm:$0xff]  }
  0x29   :  { %260 = vmatprep.mubr.bf16.mxu0 %v583_v1  ;;  %228 = vmatprep.subr.bf16.mxu0 %v470_v2  ;;  %v474_v5 = vld [vmem:[#allocation6 + $0x1c] ss:$12 sps:$4 sm:$0xff]   ;;  %v476_v6 = vld [vmem:[#allocation6 + $0x20] ss:$12 sps:$4 sm:$0xff]   ;;  %v477_v7 = vld [vmem:[#allocation6 + $0x18] ss:$12 sps:$4 sm:$0xff]  }
  0x2a   :  { %441 = vmatpush3.bf16.msra.mxu1 %v472_v3  ;;  %229 = vmatpush1.bf16.msra.mxu0 %v473_v4  ;;  %v478_v8 = vld [vmem:[#allocation6 + $0x34] ss:$12 sps:$4 sm:$0xff]   ;;  %v480_v9 = vld [vmem:[#allocation6 + $0x38] ss:$12 sps:$4 sm:$0xff]   ;;  %v481_v10 = vld [vmem:[#allocation6 + $0x30] ss:$12 sps:$4 sm:$0xff]  }
  0x2b   :  { %442 = vmatprep.subr.bf16.mxu1 %v581_v0  ;;  %230 = vmatprep.subr.bf16.mxu0 %v474_v5  ;;  %v482_v11 = vld [vmem:[#allocation6 + $0x4c] ss:$12 sps:$4 sm:$0xff]   ;;  %v484_v12 = vld [vmem:[#allocation6 + $0x50] ss:$12 sps:$4 sm:$0xff]   ;;  %v485_v13 = vld [vmem:[#allocation6 + $0x48] ss:$12 sps:$4 sm:$0xff]  }
  0x2c   :  { %v486_v14 = vld [vmem:[#allocation6 + $0x64] ss:$12 sps:$4 sm:$0xff]   ;;  %v488_v15 = vld [vmem:[#allocation6 + $0x68] ss:$12 sps:$4 sm:$0xff]   ;;  %v489_v16 = vld [vmem:[#allocation6 + $0x60] ss:$12 sps:$4 sm:$0xff]  }
  0x2d   :  { %v490_v17 = vld [vmem:[#allocation6 + $0x7c] ss:$12 sps:$4 sm:$0xff]   ;;  %v492_v18 = vld [vmem:[#allocation6 + $0x80] ss:$12 sps:$4 sm:$0xff]   ;;  %v493_v19 = vld [vmem:[#allocation6 + $0x78] ss:$12 sps:$4 sm:$0xff]  }
  0x2e   :  { %443 = vmatpush3.bf16.msra.mxu1 %v476_v6  ;;  %231 = vmatpush1.bf16.msra.mxu0 %v477_v7  ;;  %v494_v20 = vld [vmem:[#allocation6 + $0x94] ss:$12 sps:$4 sm:$0xff]   ;;  %v496_v21 = vld [vmem:[#allocation6 + $0x98] ss:$12 sps:$4 sm:$0xff]   ;;  %v497_v22 = vld [vmem:[#allocation6 + $0x90] ss:$12 sps:$4 sm:$0xff]  }
  0x2f   :  { %444 = vmatprep.subr.bf16.mxu1 %v581_v0  ;;  %232 = vmatprep.subr.bf16.mxu0 %v478_v8  ;;  %v498_v23 = vld [vmem:[#allocation6 + $0xac] ss:$12 sps:$4 sm:$0xff]   ;;  %v500_v24 = vld [vmem:[#allocation6 + $0xb0] ss:$12 sps:$4 sm:$0xff]   ;;  %v501_v25 = vld [vmem:[#allocation6 + $0xa8] ss:$12 sps:$4 sm:$0xff]  }
  0x30   :  { %v336_v28 = vshrl.u32 %v335_v27, 7  ;;  %v333_v30 = vld [vmem:[%s652_s2] sm:$0x7]  ;;  %s584_s2 = smov [#allocation8]  }
  0x31   :  { %s385_s13 = sshll.u32 %s584_s2, 4  ;;  %s386_s13 = int_to_ptr.vmem [resolvable:$true] %s385_s13 }
  0x32   :  { %445 = vmatpush3.bf16.msra.mxu1 %v480_v9  ;;  %233 = vmatpush1.bf16.msra.mxu0 %v481_v10  ;;  %v345_v29 = vsub.s32 2, %v336_v28  ;;  %v337_v31 = vsub.s32 0, %v336_v28  ;;  %v341_v32 = vsub.s32 1, %v336_v28  ;;  %s547_s14 = scalar_lea.vmem %s386_s13, 384  ;;  %p552_p3 = scmp.lt.s32.totalorder %s386_s13, %s386_s13 }
  0x33   :  { %446 = vmatprep.subr.bf16.mxu1 %v581_v0  ;;  %234 = vmatprep.subr.bf16.mxu0 %v482_v11  ;;  %p548_p2 = scmp.ne.s32.totalorder %s386_s13, %s547_s14  ;;  %p553_p4 = scmp.lt.s32.totalorder %s547_s14, %s547_s14 }
  0x34   :  { %v346_v33 = vrot.slane %v333_v30, %v345_v29  ;;  %v338_v34 = vrot.slane %v333_v30, %v337_v31  ;;  %v342_v35 = vrot.slane %v333_v30, %v341_v32 }
  0x35   :  { %p554_p5 = por %p553_p4, %p552_p3 }
  0x36   :  { %447 = vmatpush3.bf16.msra.mxu1 %v484_v12  ;;  %235 = vmatpush1.bf16.msra.mxu0 %v485_v13 }
  0x37   :  { %448 = vmatprep.subr.bf16.mxu1 %v581_v0  ;;  %236 = vmatprep.subr.bf16.mxu0 %v486_v14  ;;  %p555_p6 = pnand %p554_p5, %p548_p2 }
  0x3a   :  { %449 = vmatpush3.bf16.msra.mxu1 %v488_v15  ;;  %237 = vmatpush1.bf16.msra.mxu0 %v489_v16 }
  0x3b   :  { %450 = vmatprep.subr.bf16.mxu1 %v581_v0  ;;  %238 = vmatprep.subr.bf16.mxu0 %v490_v17 }
  0x3e   :  { %451 = vmatpush3.bf16.msra.mxu1 %v492_v18  ;;  %239 = vmatpush1.bf16.msra.mxu0 %v493_v19 }
  0x3f   :  { %452 = vmatprep.subr.bf16.mxu1 %v581_v0  ;;  %240 = vmatprep.subr.bf16.mxu0 %v494_v20 }
  0x42   :  { %453 = vmatpush3.bf16.msra.mxu1 %v496_v21  ;;  %241 = vmatpush1.bf16.msra.mxu0 %v497_v22 }
  0x43   :  { %454 = vmatprep.subr.bf16.mxu1 %v581_v0  ;;  %242 = vmatprep.subr.bf16.mxu0 %v498_v23 }
  0x46   :  { %455 = vmatpush3.bf16.msra.mxu1 %v500_v24  ;;  %243 = vmatpush1.bf16.msra.mxu0 %v501_v25 }
  0x49   :  { %457 = vmatmul.mubr.bf16.vlgmr.msra.gmra.mrb[0].mxu1 %v502_v26  ;;  %261 = vmatmul.mubr.bf16.vlgmr.msra.gmra.mrb[0].mxu0 %v502_v26 }
 0x11c   :  { %v305_v36 = vpop.f32.mrb[0].mxu1  ;;  %v262_v38 = vpop.f32.mrb[0].mxu0 }
 0x11d   :  { %v352_v37 = vadd.f32 %v346_v33, %v305_v36  ;;  %v458_v39 = vpop.f32.mrb[1].mxu1  ;;  %v350_v40 = vadd.f32 %v338_v34, %v262_v38  ;;  %v264_v41 = vpop.f32.mrb[1].mxu0 }
 0x11e   :  { %v308_v42 = vpop.f32.mrb[2].mxu1  ;;  %v351_v44 = vadd.f32 %v342_v35, %v264_v41  ;;  %v266_v46 = vpop.f32.mrb[2].mxu0 }
 0x11f   :  { %v428_v43 = vpack.c.bf16 %v352_v37, %v352_v37  ;;  %v355_v45 = vadd.f32 %v346_v33, %v308_v42  ;;  %v459_v47 = vpop.f32.mrb[3].mxu1  ;;  %v353_v48 = vadd.f32 %v338_v34, %v266_v46  ;;  %v268_v49 = vpop.f32.mrb[3].mxu0 }
 0x120   :  { %v427_v50 = vpack.c.bf16 %v351_v44, %v350_v40  ;;  %v354_v52 = vadd.f32 %v342_v35, %v268_v49 }
 0x121   :  { %377 = vst [vmem:[#allocation8 + $0x8] sm:$0xf] %v428_v43  ;;  %v430_v51 = vpack.c.bf16 %v355_v45, %v355_v45 }
 0x122   :  { %376 = vst [vmem:[#allocation8] sm:$0xff] %v427_v50  ;;  %v429_v53 = vpack.c.bf16 %v354_v52, %v353_v48 }
 0x123   :  { %379 = vst [vmem:[#allocation8 + $0x14] sm:$0xf] %v430_v51 }
 0x124   :  { %378 = vst [vmem:[#allocation8 + $0xc] sm:$0xff] %v429_v53 }
 0x125   :  { %558 = shalt.err (!%p555_p6)
}
 0x126   :  { %s559_s17 = scalar_lea.hbm %s653_s3, 384 }
 0x127   :  { %p560_p7 = scmp.ne.s32.totalorder %s653_s3, %s559_s17  ;;  %p563_p8 = scmp.lt.u32.totalorder %s559_s17, %s653_s3 }
 0x129   :  { %p565_p9 = pnand %p563_p8, %p560_p7 }
 0x12b   :  { %568 = shalt.err (!%p565_p9)
}
 0x12c   :  { %391 = dma.vmem_to_hbm [thread:$0]  %s386_s13, 384, %s653_s3, [#allocation5], %s579_s0, %s579_s0, %s580_s9  }
 0x12d   :  { %573 = dma.done.wait [#allocation5], 384  }
 0x12e   :  { %574 = vsyncadd [#allocation5], 4294966912 }
 0x12f   :  { %395 = vsyncpa [#allocation4], 1 }
 0x130   :  { %396 = vsyncpa [#allocation7], 1 }
 0x131   :  { %397 = vsyncpa [#allocation5], 1 }

</bundles_post_ra>
